<compile_context>
chip_gen: v5e
topology: v5e:2x2
jax: 0.10.0
libtpu: 0.0.40
codegen_flags: <defaults>
</compile_context>

<pallas_src>
import math
import functools

import jax
import jax.numpy as jnp
from jax.experimental import pallas as pl
from jax.experimental.pallas import tpu as pltpu

_LN_EPS = 1e-5


def _build_table_kernel(cs_ref, ie_ref, w_ref, b_ref, table_ref):
    # cs_ref: (N, D) cumsum_embedding; ie_ref: (2, D) interpolation_embedding
    # w_ref/b_ref: (1, D) LayerNorm affine params; table_ref: (N, D) output
    n, d = table_ref.shape
    cs = cs_ref[...]

    # tril(ones(N,N)) @ cumsum_embedding on the MXU (tril built from iota, no extra input).
    row = jax.lax.broadcasted_iota(jnp.int32, (n, n), 0)
    col = jax.lax.broadcasted_iota(jnp.int32, (n, n), 1)
    tril = (col <= row).astype(jnp.float32)
    csum = jnp.dot(tril, cs, preferred_element_type=jnp.float32)

    # LayerNorm over last dim (biased variance, eps=1e-5), elementwise affine.
    mean = jnp.mean(csum, axis=-1, keepdims=True)
    var = jnp.mean((csum - mean) ** 2, axis=-1, keepdims=True)
    normed = (csum - mean) * jax.lax.rsqrt(var + _LN_EPS)
    normed = normed * w_ref[...] + b_ref[...]

    # interpolation_matrix @ interpolation_embedding == alpha*e0 + (1-alpha)*e1
    pos = jax.lax.broadcasted_iota(jnp.int32, (n, d), 0).astype(jnp.float32)
    max_rating = jnp.float32(n - 1)
    alpha = (max_rating - pos) / max_rating
    interp = alpha * ie_ref[0:1, :] + (1.0 - alpha) * ie_ref[1:2, :]

    table_ref[...] = normed + interp


def _gather_kernel(idx_ref, table_ref, out_ref):
    # idx_ref:   (1, TM) int32   lane-dense index tile
    # table_ref: (N, D)  float32 precomputed table (constant block index -> VMEM resident)
    # out_ref:   (TM, D) float32
    n = table_ref.shape[0]
    tm = out_ref.shape[0]
    row_ids = jax.lax.broadcasted_iota(jnp.int32, (n, tm), 0)
    # (N, TM) transposed one-hot: pure lane-wise compare, no cross-lane index movement.
    one_hot_t = (row_ids == idx_ref[...]).astype(jnp.float32)
    # out = one_hot_t.T @ table (MXU, contracting the N axis of both operands).
    out_ref[...] = jax.lax.dot_general(
        one_hot_t,
        table_ref[...],
        dimension_numbers=(((0,), (0,)), ((), ())),
        preferred_element_type=jnp.float32,
    )


def _build_table(cumsum_embedding, interpolation_embedding, ln_weight, ln_bias):
    n, d = cumsum_embedding.shape
    return pl.pallas_call(
        _build_table_kernel,
        out_shape=jax.ShapeDtypeStruct((n, d), jnp.float32),
        cost_estimate=pl.CostEstimate(
            flops=2 * n * n * d + 10 * n * d,
            transcendentals=n,
            bytes_accessed=4 * (2 * n * d + 2 * d + 2 * d),
        ),
    )(
        cumsum_embedding.astype(jnp.float32),
        interpolation_embedding.astype(jnp.float32),
        ln_weight.reshape(1, d).astype(jnp.float32),
        ln_bias.reshape(1, d).astype(jnp.float32),
    )


def _gather(index_tensor, table, *, tile_m):
    n, d = table.shape
    orig_shape = index_tensor.shape
    m = index_tensor.size
    padded_m = pl.cdiv(m, tile_m) * tile_m
    num_tiles = padded_m // tile_m

    idx_flat = index_tensor.reshape(m).astype(jnp.int32)
    idx_flat = jnp.pad(idx_flat, (0, padded_m - m))   # pad with 0 (valid row, sliced off)
    idx_2d = idx_flat.reshape(1, padded_m)            # lane-dense index stream

    # Explicit VMEM budget: resident table + double-buffered idx/out tiles + slack.
    vmem_bytes = 4 * (2 * n * d + 2 * tile_m + 2 * tile_m * d) + (2 << 20)

    out_flat = pl.pallas_call(
        _gather_kernel,
        out_shape=jax.ShapeDtypeStruct((padded_m, d), jnp.float32),
        grid=(num_tiles,),
        in_specs=[
            pl.BlockSpec((1, tile_m), lambda i: (0, i)),   # indices (lane-dense tile)
            pl.BlockSpec((n, d), lambda i: (0, 0)),        # full table, constant block
        ],
        out_specs=pl.BlockSpec((tile_m, d), lambda i: (i, 0)),
        compiler_params=pltpu.CompilerParams(
            dimension_semantics=("parallel",),
            vmem_limit_bytes=max(vmem_bytes, 4 * 1024 * 1024),
        ),
        cost_estimate=pl.CostEstimate(
            flops=2 * padded_m * n * d,
            transcendentals=0,
            bytes_accessed=4 * (padded_m + n * d + padded_m * d),
        ),
    )(idx_2d, table)

    return out_flat[:m].reshape(*orig_shape, d)


@functools.partial(jax.jit, static_argnames=("tile_m",))
def cumsum_interpolation_embedding(index_tensor, cumsum_embedding,
                                   interpolation_embedding, ln_weight, ln_bias,
                                   *, tile_m=128):
    """index_tensor: int array (any shape); returns float32 array of shape (*idx, D)."""
    table = _build_table(cumsum_embedding, interpolation_embedding, ln_weight, ln_bias)
    return _gather(index_tensor, table, tile_m=tile_m)


def xavier_normal(key, shape):
    # torch.nn.init.xavier_normal_: std = sqrt(2 / (fan_in + fan_out))
    std = math.sqrt(2.0 / (shape[0] + shape[1]))
    return std * jax.random.normal(key, shape, jnp.float32)


def _reference(index_tensor, cumsum_embedding, interpolation_embedding, ln_weight, ln_bias):
    n, d = cumsum_embedding.shape
    csum = jnp.cumsum(cumsum_embedding, axis=0)        # == tril @ cumsum_embedding
    mean = jnp.mean(csum, axis=-1, keepdims=True)
    var = jnp.mean((csum - mean) ** 2, axis=-1, keepdims=True)
    normed = (csum - mean) / jnp.sqrt(var + _LN_EPS) * ln_weight + ln_bias
    pos = jnp.arange(n, dtype=jnp.float32)[:, None]
    alpha = (n - 1.0 - pos) / (n - 1.0)
    interp = alpha * interpolation_embedding[0:1] + (1.0 - alpha) * interpolation_embedding[1:2]
    table = normed + interp
    return table[index_tensor]


if __name__ == "__main__":
    key = jax.random.PRNGKey(0)
    k_cs, k_ie, k_idx = jax.random.split(key, 3)

    num_embeddings = 16
    embedding_dim = 32
    batch, seq = 2, 8

    cumsum_embedding = xavier_normal(k_cs, (num_embeddings, embedding_dim))
    interpolation_embedding = xavier_normal(k_ie, (2, embedding_dim))
    ln_weight = jnp.ones((embedding_dim,), jnp.float32)   # LayerNorm default affine init
    ln_bias = jnp.zeros((embedding_dim,), jnp.float32)

    index_tensor = jax.random.randint(
        k_idx, (batch, seq), minval=0, maxval=num_embeddings, dtype=jnp.int32
    )

    out = cumsum_interpolation_embedding(
        index_tensor, cumsum_embedding, interpolation_embedding, ln_weight, ln_bias
    )
    out = jax.block_until_ready(out)

    ref = _reference(index_tensor, cumsum_embedding, interpolation_embedding,
                     ln_weight, ln_bias)

    assert out.shape == (batch, seq, embedding_dim), out.shape
    max_err = float(jnp.max(jnp.abs(out - ref)))
    assert jnp.allclose(out, ref, atol=1e-4, rtol=1e-4), f"max_err={max_err}"

    print("KERNEL_OK")
</pallas_src>

<mosaic_0001>
module attributes {stable_mosaic.version = 11 : i64} {
  func.func @_gather_kernel(%arg0: i32, %arg1: memref<1x128xi32, #tpu.memory_space<vmem>>, %arg2: memref<16x32xf32, #tpu.memory_space<vmem>>, %arg3: memref<128x32xf32, #tpu.memory_space<vmem>>) attributes {dimension_semantics = [#tpu.dimension_semantics<parallel>], iteration_bounds = array<i64: 1>, scalar_prefetch = 0 : i64, scratch_operands = 0 : i64, tpu.core_type = #tpu.core_type<tc>, window_params = [{transform_indices = @transform_0, window_bounds = array<i64: 1, 128>}, {pipeline_mode = #tpu.pipeline_mode<synchronous>, transform_indices = @transform_1, window_bounds = array<i64: 16, 32>}, {transform_indices = @transform_2, window_bounds = array<i64: 128, 32>}]} {
    %0 = tpu.iota {dimensions = array<i32: 0>} : vector<16x128xi32>
    %c0 = arith.constant 0 : index
    %c0_0 = arith.constant 0 : index
    %1 = vector.load %arg1[%c0, %c0_0] : memref<1x128xi32, #tpu.memory_space<vmem>>, vector<1x128xi32>
    %2 = vector.broadcast %1 : vector<1x128xi32> to vector<16x128xi32>
    %3 = arith.cmpi eq, %0, %2 : vector<16x128xi32>
    %4 = arith.extui %3 : vector<16x128xi1> to vector<16x128xi32>
    %5 = arith.sitofp %4 : vector<16x128xi32> to vector<16x128xf32>
    %c0_1 = arith.constant 0 : index
    %c0_2 = arith.constant 0 : index
    %6 = vector.load %arg2[%c0_1, %c0_2] : memref<16x32xf32, #tpu.memory_space<vmem>>, vector<16x32xf32>
    %cst = arith.constant dense<0.000000e+00> : vector<128x32xf32>
    %7 = tpu.matmul %5, %6, %cst {dimension_numbers = #tpu.dot_dimension_numbers<[0], [0], [1], [1], [0, 1, 1, 1], [], []>} : vector<16x128xf32>, vector<16x32xf32>, vector<128x32xf32> -> vector<128x32xf32>
    %c0_3 = arith.constant 0 : index
    %c0_4 = arith.constant 0 : index
    %8 = vector.load %arg3[%c0_3, %c0_4] : memref<128x32xf32, #tpu.memory_space<vmem>>, vector<128x32xf32>
    tpu.vector_store %arg3[%c0_3, %c0_4], %7 {strides = array<i32>} : memref<128x32xf32, #tpu.memory_space<vmem>>, vector<128x32xf32>,
    return
  }
  func.func @transform_0(%arg0: i32) -> (i32, i32) {
    %c0_i32 = arith.constant 0 : i32
    %c0_i32_0 = arith.constant 0 : i32
    return %c0_i32, %arg0 : i32, i32
  }
  func.func @transform_1(%arg0: i32) -> (i32, i32) {
    %c0_i32 = arith.constant 0 : i32
    %c0_i32_0 = arith.constant 0 : i32
    %c0_i32_1 = arith.constant 0 : i32
    return %c0_i32, %c0_i32_0 : i32, i32
  }
  func.func @transform_2(%arg0: i32) -> (i32, i32) {
    %c0_i32 = arith.constant 0 : i32
    %c0_i32_0 = arith.constant 0 : i32
    return %arg0, %c0_i32 : i32, i32
  }
}

module attributes {stable_mosaic.version = 11 : i64} {
  func.func @_build_table_kernel(%arg0: memref<16x32xf32, #tpu.memory_space<vmem>>, %arg1: memref<2x32xf32, #tpu.memory_space<vmem>>, %arg2: memref<1x32xf32, #tpu.memory_space<vmem>>, %arg3: memref<1x32xf32, #tpu.memory_space<vmem>>, %arg4: memref<16x32xf32, #tpu.memory_space<vmem>>) attributes {dimension_semantics = [], scalar_prefetch = 0 : i64, scratch_operands = 0 : i64, tpu.core_type = #tpu.core_type<tc>} {
    %c0 = arith.constant 0 : index
    %c0_0 = arith.constant 0 : index
    %0 = vector.load %arg0[%c0, %c0_0] : memref<16x32xf32, #tpu.memory_space<vmem>>, vector<16x32xf32>
    %1 = tpu.iota {dimensions = array<i32: 0>} : vector<16x16xi32>
    %2 = tpu.iota {dimensions = array<i32: 1>} : vector<16x16xi32>
    %3 = arith.cmpi sle, %2, %1 : vector<16x16xi32>
    %4 = arith.extui %3 : vector<16x16xi1> to vector<16x16xi32>
    %5 = arith.sitofp %4 : vector<16x16xi32> to vector<16x16xf32>
    %cst = arith.constant dense<0.000000e+00> : vector<16x32xf32>
    %6 = tpu.matmul %5, %0, %cst {dimension_numbers = #tpu.dot_dimension_numbers<[1], [0], [0], [1], [0, 0, 1, 1], [], []>} : vector<16x16xf32>, vector<16x32xf32>, vector<16x32xf32> -> vector<16x32xf32>
    %cst_1 = arith.constant dense<0.000000e+00> : vector<16xf32>
    %7 = vector.multi_reduction <add>, %6, %cst_1 [1] : vector<16x32xf32> to vector<16xf32>
    %8 = vector.shape_cast %7 : vector<16xf32> to vector<16x1xf32>
    %cst_2 = arith.constant 3.200000e+01 : f32
    %9 = vector.broadcast %cst_2 : f32 to vector<16x1xf32>
    %10 = arith.divf %8, %9 : vector<16x1xf32>
    %11 = vector.broadcast %10 : vector<16x1xf32> to vector<16x32xf32>
    %12 = arith.subf %6, %11 : vector<16x32xf32>
    %13 = arith.mulf %12, %12 : vector<16x32xf32>
    %cst_3 = arith.constant dense<0.000000e+00> : vector<16xf32>
    %14 = vector.multi_reduction <add>, %13, %cst_3 [1] : vector<16x32xf32> to vector<16xf32>
    %15 = vector.shape_cast %14 : vector<16xf32> to vector<16x1xf32>
    %cst_4 = arith.constant 3.200000e+01 : f32
    %16 = vector.broadcast %cst_4 : f32 to vector<16x1xf32>
    %17 = arith.divf %15, %16 : vector<16x1xf32>
    %18 = vector.broadcast %10 : vector<16x1xf32> to vector<16x32xf32>
    %19 = arith.subf %6, %18 : vector<16x32xf32>
    %cst_5 = arith.constant 9.99999974E-6 : f32
    %20 = vector.broadcast %cst_5 : f32 to vector<16x1xf32>
    %21 = arith.addf %17, %20 : vector<16x1xf32>
    %22 = math.rsqrt %21 : vector<16x1xf32>
    %23 = vector.broadcast %22 : vector<16x1xf32> to vector<16x32xf32>
    %24 = arith.mulf %19, %23 : vector<16x32xf32>
    %c0_6 = arith.constant 0 : index
    %c0_7 = arith.constant 0 : index
    %25 = vector.load %arg2[%c0_6, %c0_7] : memref<1x32xf32, #tpu.memory_space<vmem>>, vector<1x32xf32>
    %26 = vector.broadcast %25 : vector<1x32xf32> to vector<16x32xf32>
    %27 = arith.mulf %24, %26 : vector<16x32xf32>
    %c0_8 = arith.constant 0 : index
    %c0_9 = arith.constant 0 : index
    %28 = vector.load %arg3[%c0_8, %c0_9] : memref<1x32xf32, #tpu.memory_space<vmem>>, vector<1x32xf32>
    %29 = vector.broadcast %28 : vector<1x32xf32> to vector<16x32xf32>
    %30 = arith.addf %27, %29 : vector<16x32xf32>
    %31 = tpu.iota {dimensions = array<i32: 0>} : vector<16x32xi32>
    %32 = arith.sitofp %31 : vector<16x32xi32> to vector<16x32xf32>
    %cst_10 = arith.constant 1.500000e+01 : f32
    %33 = vector.broadcast %cst_10 : f32 to vector<16x32xf32>
    %34 = arith.subf %33, %32 : vector<16x32xf32>
    %cst_11 = arith.constant 1.500000e+01 : f32
    %35 = vector.broadcast %cst_11 : f32 to vector<16x32xf32>
    %36 = arith.divf %34, %35 : vector<16x32xf32>
    %c0_12 = arith.constant 0 : index
    %c0_13 = arith.constant 0 : index
    %37 = vector.load %arg1[%c0_12, %c0_13] : memref<2x32xf32, #tpu.memory_space<vmem>>, vector<1x32xf32>
    %38 = vector.broadcast %37 : vector<1x32xf32> to vector<16x32xf32>
    %39 = arith.mulf %36, %38 : vector<16x32xf32>
    %cst_14 = arith.constant 1.000000e+00 : f32
    %40 = vector.broadcast %cst_14 : f32 to vector<16x32xf32>
    %41 = arith.subf %40, %36 : vector<16x32xf32>
    %c1 = arith.constant 1 : index
    %c0_15 = arith.constant 0 : index
    %42 = vector.load %arg1[%c1, %c0_15] : memref<2x32xf32, #tpu.memory_space<vmem>>, vector<1x32xf32>
    %43 = vector.broadcast %42 : vector<1x32xf32> to vector<16x32xf32>
    %44 = arith.mulf %41, %43 : vector<16x32xf32>
    %45 = arith.addf %39, %44 : vector<16x32xf32>
    %46 = arith.addf %30, %45 : vector<16x32xf32>
    %c0_16 = arith.constant 0 : index
    %c0_17 = arith.constant 0 : index
    %47 = vector.load %arg4[%c0_16, %c0_17] : memref<16x32xf32, #tpu.memory_space<vmem>>, vector<16x32xf32>
    tpu.vector_store %arg4[%c0_16, %c0_17], %46 {strides = array<i32>} : memref<16x32xf32, #tpu.memory_space<vmem>>, vector<16x32xf32>,
    return
  }
}

</mosaic_0001>

<bundles_post_ra>
// kernel: cumsum_interpolation_embedding.2
= control target key start
LH: loop header
LB: loop body
LE: loop exit
PB: predicated region body
PF: predicated region fallthrough
CT: control target
= control target key end

     0   :  { %9 = vsyncpa [#allocation3], 0  ;;  %s224_s18 = smov [#allocation2]   ;;  %s225_s20 = smov 128   ;;  %s291_s0 = inlined_call_operand.hbm [shape: f32[16,32], index: 0, kind: input, shape index: {}]   ;;  %s292_s1 = inlined_call_operand.vmem [shape: f32[2,32], index: 1, kind: input, shape index: {}]   ;;  %s293_s2 = inlined_call_operand.vmem [shape: f32[1,32], index: 2, kind: input, shape index: {}]   ;;  %s294_s3 = inlined_call_operand.vmem [shape: f32[1,32], index: 3, kind: input, shape index: {}]   ;;  %s295_s4 = inlined_call_operand.vmem [shape: f32[16,32], index: 4, kind: output, shape index: {}]  }
   0x1   :  { %s14_s17 = sshll.u32 %s291_s0, 4  ;;  %s16_s19 = sshll.u32 %s224_s18, 4  ;;  %s15_s17 = int_to_ptr.hbm [resolvable:$true] %s14_s17  ;;  %s17_s19 = int_to_ptr.vmem [resolvable:$true] %s16_s19 }
   0x2   :  { %s226_s21 = smov 8  }
   0x3   :  { %22 = dma.hbm_to_vmem [thread:$0]  %s15_s17, 256, %s17_s19, [#allocation3], %s225_s20, %s225_s20, %s226_s21  }
   0x4   :  { %222 = dma.done.wait [#allocation3], 256  }
   0x5   :  { %223 = vsyncadd [#allocation3], 4294967040  ;;  %v35_v0 = vlaneseq  ;;  %v34_v4 = vld [vmem:[#allocation2 + $0x8] sm:$0xff]  ;;  %v33_v5 = vld [vmem:[#allocation2] sm:$0xff]  ;;  %v227_v6 = vmov 0.0   ;;  %vm46_vm2 = vcmask 130048  }
   0x6   :  { %67 = vmatpush.msra.mxu0 %v34_v4  ;;  %178 = vmatpush.msra.mxu1 %v34_v4  ;;  %vm76_vm3 = vcmask 261120   ;;  %v228_v13 = vmov 32.0   ;;  %v229_v30 = vmov 15.0   ;;  %v186_v52 = vld [vmem:[%s292_s1] ss:$0 sm:$0xff] }
   0x7   :  { %v36_v1 = vshrl.u32 %v35_v0, 7  ;;  %v39_v2 = vand.u32 127, %v35_v0  ;;  %190 = vrcp.f32 %v228_v13  ;;  %v187_v54 = vld [vmem:[%s292_s1 + $0x1] ss:$0 sm:$0xff]  ;;  %v188_v62 = vld [vmem:[%s293_s2] ss:$0 sm:$0xff] }
   0x8   :  { %68 = vmatpush.msra.mxu0 %v33_v5  ;;  %179 = vmatpush.msra.mxu1 %v33_v5  ;;  %192 = vrcp.f32 %v229_v30 }
   0x9   :  { %v258_v3 = vadd.s32 8, %v36_v1  ;;  %vm40_vm0 = vcmp.le.s32.totalorder %v39_v2, %v36_v1  ;;  %v140_v38 = vcvt.s32.f32 %v36_v1  ;;  %v189_v1 = vld [vmem:[%s294_s3] ss:$0 sm:$0xff] }
   0xa   :  { %v174_v7 = vsel %vm40_vm0, 1.0, %v227_v6 }
   0xb   :  { %vm41_vm1 = vcmp.le.s32.totalorder %v39_v2, %v258_v3  ;;  %176 = vmatmul.msk.f32.vlgmr.msra.gmra.mxu0 %vm46_vm2, %v174_v7  ;;  %v142_v41 = vsub.f32 15.0, %v140_v38  ;;  %v141_v47 = vcvt.s32.f32 %v258_v3 }
   0xc   :  { %v175_v8 = vsel %vm41_vm1, 1.0, %v227_v6 }
   0xd   :  { %177 = vmatmul.msk.f32.vlgmr.msra.gmra.mxu1 %vm46_vm2, %v175_v8  ;;  %v191_v14 = vpop.eup %190  ;;  %v143_v51 = vsub.f32 15.0, %v141_v47 }
   0xe   :  { %v84_v15 = vmul.f32 32.0, %v191_v14  ;;  %vm88_vm4 = vweird.f32 %v191_v14  ;;  %v193_v31 = vpop.eup %192 }
   0xf   :  { %v145_v32 = vmul.f32 15.0, %v193_v31  ;;  %vm149_vm5 = vweird.f32 %v193_v31 }
  0x10   :  { %v85_v16 = vsub.f32 1.0, %v84_v15 }
  0x11   :  { %v146_v33 = vsub.f32 1.0, %v145_v32 }
  0x12   :  { %v86_v17 = vmul.f32 %v191_v14, %v85_v16 }
  0x13   :  { %v147_v36 = vmul.f32 %v193_v31, %v146_v33 }
  0x14   :  { %v87_v18 = vadd.f32 %v191_v14, %v86_v17 }
  0x15   :  { %v148_v39 = vadd.f32 %v193_v31, %v147_v36 }
  0x16   :  { %v89_v19 = vsel %vm88_vm4, %v191_v14, %v87_v18 }
  0x17   :  { %v150_v43 = vsel %vm149_vm5, %v193_v31, %v148_v39 }
  0x18   :  { %v151_v48 = vmul.f32 %v150_v43, %v142_v41  ;;  %v152_v59 = vmul.f32 %v150_v43, %v143_v51 }
  0x1a   :  { %v157_v53 = vsub.f32 1.0, %v151_v48  ;;  %v155_v60 = vmul.f32 %v186_v52, %v151_v48  ;;  %v158_v4 = vsub.f32 1.0, %v152_v59 }
  0x1c   :  { %v161_v61 = vmul.f32 %v187_v54, %v157_v53 }
  0x1e   :  { %v163_v5 = vadd.f32 %v161_v61, %v155_v60 }
  0x88   :  { %v70_v9 = vpop.f32.mrf.mxu0 }
  0x89   :  { %v77_v10 = vsel %vm76_vm3, %v70_v9, 0.0 }
  0x8a   :  { %78 = vadd.xlane.f32.xlu0 %v77_v10  ;;  %v73_v11 = vpop.f32.mrf.mxu1  ;;  %v156_v10 = vmul.f32 %v186_v52, %v152_v59 }
  0x8b   :  { %v80_v12 = vsel %vm76_vm3, %v73_v11, 0.0 }
  0x92   :  { %81 = vadd.xlane.f32.xlu0 %v80_v12 }
  0xfd   :  { %v79_v20 = vpop.xlane.xlu0 %78 }
  0xfe   :  { %v90_v21 = vmul.f32 %v89_v19, %v79_v20 }
 0x100   :  { %v92_v22 = vsub.f32 %v70_v9, %v90_v21 }
 0x102   :  { %v94_v23 = vmul.f32 %v92_v22, %v92_v22 }
 0x104   :  { %v96_v24 = vsel %vm76_vm3, %v94_v23, 0.0 }
 0x105   :  { %97 = vadd.xlane.f32.xlu1 %v96_v24  ;;  %v82_v25 = vpop.xlane.xlu0 %81 }
 0x106   :  { %v91_v26 = vmul.f32 %v89_v19, %v82_v25 }
 0x108   :  { %v264_v27 = vsub.f32 %v73_v11, %v91_v26  ;;  %v162_v11 = vmul.f32 %v187_v54, %v158_v4 }
 0x10a   :  { %v95_v28 = vmul.f32 %v264_v27, %v264_v27  ;;  %v164_v15 = vadd.f32 %v162_v11, %v156_v10 }
 0x10c   :  { %v99_v29 = vsel %vm76_vm3, %v95_v28, 0.0 }
 0x10d   :  { %100 = vadd.xlane.f32.xlu1 %v99_v29 }
 0x178   :  { %v98_v34 = vpop.xlane.xlu1 %97 }
 0x179   :  { %v102_v35 = vmul.f32 %v98_v34, %v89_v19 }
 0x17b   :  { %v104_v37 = vadd.f32 1e-05, %v102_v35 }
 0x17d   :  { %194 = vrsqrt.f32 %v104_v37  ;;  %vm112_vm7 = vweird.f32 %v104_v37 }
 0x180   :  { %v101_v40 = vpop.xlane.xlu1 %100 }
 0x181   :  { %v103_v42 = vmul.f32 %v101_v40, %v89_v19 }
 0x183   :  { %v195_v44 = vpop.eup %194  ;;  %v105_v45 = vadd.f32 1e-05, %v103_v42 }
 0x184   :  { %v107_v46 = vmul.f32 %v195_v44, %v104_v37  ;;  %vm113_vm6 = vweird.f32 %v195_v44 }
 0x185   :  { %196 = vrsqrt.f32 %v105_v45  ;;  %vm114_vm8 = vmor %vm112_vm7, %vm113_vm6  ;;  %vm122_vm10 = vweird.f32 %v105_v45 }
 0x186   :  { %v108_v49 = vmul.f32 %v195_v44, %v107_v46 }
 0x188   :  { %v109_v50 = vmul.f32 0.5, %v108_v49 }
 0x18a   :  { %v110_v55 = vsub.f32 1.5, %v109_v50 }
 0x18b   :  { %v197_v56 = vpop.eup %196 }
 0x18c   :  { %v111_v57 = vmul.f32 %v195_v44, %v110_v55  ;;  %v117_v58 = vmul.f32 %v197_v56, %v105_v45  ;;  %vm123_vm9 = vweird.f32 %v197_v56 }
 0x18d   :  { %vm124_vm11 = vmor %vm122_vm10, %vm123_vm9 }
 0x18e   :  { %v115_v63 = vsel %vm114_vm8, %v195_v44, %v111_v57  ;;  %v118_v0 = vmul.f32 %v197_v56, %v117_v58 }
 0x18f   :  { %v126_v2 = vmul.f32 %v115_v63, %v92_v22 }
 0x190   :  { %v119_v3 = vmul.f32 0.5, %v118_v0 }
 0x191   :  { %v132_v6 = vmul.f32 %v188_v62, %v126_v2 }
 0x192   :  { %v120_v7 = vsub.f32 1.5, %v119_v3 }
 0x193   :  { %v138_v8 = vadd.f32 %v189_v1, %v132_v6 }
 0x194   :  { %v121_v9 = vmul.f32 %v197_v56, %v120_v7 }
 0x195   :  { %v165_v12 = vadd.f32 %v163_v5, %v138_v8 }
 0x196   :  { %v125_v13 = vsel %vm124_vm11, %v197_v56, %v121_v9 }
 0x197   :  { %167 = vst.msk [vmem:[%s295_s4] sm:$0xff] %vm76_vm3, %v165_v12  ;;  %v127_v14 = vmul.f32 %v125_v13, %v264_v27 }
 0x199   :  { %v133_v16 = vmul.f32 %v188_v62, %v127_v14 }
 0x19b   :  { %v139_v17 = vadd.f32 %v189_v1, %v133_v16 }
 0x19d   :  { %v166_v18 = vadd.f32 %v164_v15, %v139_v17 }
 0x19f   :  { %168 = vst.msk [vmem:[%s295_s4 + $0x8] sm:$0xff] %vm76_vm3, %v166_v18 }
 0x1a0   :  { %173 = vsyncpa [#allocation3], 1 }

// kernel: cumsum_interpolation_embedding.3
= control target key start
LH: loop header
LB: loop body
LE: loop exit
PB: predicated region body
PF: predicated region fallthrough
CT: control target
= control target key end

     0   :  { %v11_v0 = vlaneseq  ;;  %v217_v6 = vmov 0.0   ;;  %vm56_vm2 = vcmask 130048   ;;  %vm170_vm3 = vcmask 261120   ;;  %s322_s0 = inlined_call_operand.vmem [shape: s32[1,128], index: 0, kind: input, shape index: {}]   ;;  %s323_s1 = inlined_call_operand.vmem [shape: f32[16,32], index: 1, kind: input, shape index: {}]   ;;  %s324_s2 = inlined_call_operand.vmem [shape: f32[128,32], index: 2, kind: output, shape index: {}]  }
   0x1   :  { %v216_v1 = vld [vmem:[%s322_s0] ss:$0 sm:$0xff]  ;;  %v23_v2 = vld [vmem:[%s323_s1 + $0x8] sm:$0xff] }
   0x2   :  { %v12_v3 = vshrl.u32 %v11_v0, 7  ;;  %119 = vmatpush.msra.mxu0 %v23_v2  ;;  %v22_v4 = vld [vmem:[%s323_s1] sm:$0xff]  ;;  %209 = vmatpush.msra.mxu1 %v23_v2 }
   0x3   :  { %210 = vmatpush.msra.mxu2 %v23_v2  ;;  %211 = vmatpush.msra.mxu3 %v23_v2 }
   0x4   :  { %vm16_vm0 = vcmp.eq.s32.totalorder %v12_v3, %v216_v1  ;;  %v13_v5 = vadd.s32 8, %v12_v3  ;;  %120 = vmatpush.msra.mxu0 %v22_v4  ;;  %212 = vmatpush.msra.mxu1 %v22_v4 }
   0x5   :  { %v191_v7 = vsel %vm16_vm0, 1.0, %v217_v6  ;;  %213 = vmatpush.msra.mxu2 %v22_v4  ;;  %214 = vmatpush.msra.mxu3 %v22_v4 }
   0x6   :  { %24 = vxpose.xlu0.b32.start [1/2] (short) %v191_v7, 128  ;;  %vm17_vm1 = vcmp.eq.s32.totalorder %v13_v5, %v216_v1 }
   0x7   :  { %v192_v8 = vsel %vm17_vm1, 1.0, %v217_v6 }
   0xe   :  { %25 = vxpose.xlu0.b32.end [2/2] (short) %v192_v8, 128 }
  0xaa   :  { %v40_v9 = vpop.trf.xlu0 }
  0xab   :  { %193 = vmatmul.msk.f32.vlgmr.msra.gmra.mxu0 %vm56_vm2, %v40_v9 }
  0xb2   :  { %v41_v10 = vpop.trf.xlu0 }
  0xb3   :  { %194 = vmatmul.msk.f32.gmra.mxu0 %vm56_vm2, %v41_v10 }
  0xba   :  { %v42_v11 = vpop.trf.xlu0 }
  0xbb   :  { %195 = vmatmul.msk.f32.gmra.mxu0 %vm56_vm2, %v42_v11 }
  0xc2   :  { %v43_v12 = vpop.trf.xlu0 }
  0xc3   :  { %196 = vmatmul.msk.f32.gmra.mxu0 %vm56_vm2, %v43_v12 }
  0xca   :  { %v44_v13 = vpop.trf.xlu0 }
  0xcb   :  { %197 = vmatmul.msk.f32.vlgmr.msra.gmra.mxu1 %vm56_vm2, %v44_v13 }
  0xd2   :  { %v45_v14 = vpop.trf.xlu0 }
  0xd3   :  { %198 = vmatmul.msk.f32.gmra.mxu1 %vm56_vm2, %v45_v14 }
  0xda   :  { %v46_v15 = vpop.trf.xlu0 }
  0xdb   :  { %199 = vmatmul.msk.f32.gmra.mxu1 %vm56_vm2, %v46_v15 }
  0xe2   :  { %v47_v16 = vpop.trf.xlu0 }
  0xe3   :  { %200 = vmatmul.msk.f32.gmra.mxu1 %vm56_vm2, %v47_v16 }
  0xea   :  { %v48_v17 = vpop.trf.xlu0 }
  0xeb   :  { %201 = vmatmul.msk.f32.vlgmr.msra.gmra.mxu2 %vm56_vm2, %v48_v17 }
  0xf2   :  { %v49_v18 = vpop.trf.xlu0 }
  0xf3   :  { %202 = vmatmul.msk.f32.gmra.mxu2 %vm56_vm2, %v49_v18 }
  0xfa   :  { %v50_v19 = vpop.trf.xlu0 }
  0xfb   :  { %203 = vmatmul.msk.f32.gmra.mxu2 %vm56_vm2, %v50_v19 }
 0x102   :  { %v51_v20 = vpop.trf.xlu0 }
 0x103   :  { %204 = vmatmul.msk.f32.gmra.mxu2 %vm56_vm2, %v51_v20 }
 0x10a   :  { %v52_v21 = vpop.trf.xlu0 }
 0x10b   :  { %205 = vmatmul.msk.f32.vlgmr.msra.gmra.mxu3 %vm56_vm2, %v52_v21 }
 0x112   :  { %v53_v22 = vpop.trf.xlu0 }
 0x113   :  { %206 = vmatmul.msk.f32.gmra.mxu3 %vm56_vm2, %v53_v22 }
 0x11a   :  { %v54_v23 = vpop.trf.xlu0 }
 0x11b   :  { %207 = vmatmul.msk.f32.gmra.mxu3 %vm56_vm2, %v54_v23 }
 0x122   :  { %v55_v24 = vpop.trf.xlu0 }
 0x123   :  { %208 = vmatmul.msk.f32.gmra.mxu3 %vm56_vm2, %v55_v24 }
 0x128   :  { %v122_v25 = vpop.f32.mrf.mxu0 }
 0x129   :  { %171 = vst.msk [vmem:[%s324_s2] sm:$0xff] %vm170_vm3, %v122_v25 }
 0x130   :  { %v125_v26 = vpop.f32.mrf.mxu0 }
 0x131   :  { %172 = vst.msk [vmem:[%s324_s2 + $0x8] sm:$0xff] %vm170_vm3, %v125_v26 }
 0x138   :  { %v128_v27 = vpop.f32.mrf.mxu0 }
 0x139   :  { %173 = vst.msk [vmem:[%s324_s2 + $0x10] sm:$0xff] %vm170_vm3, %v128_v27 }
 0x140   :  { %v131_v28 = vpop.f32.mrf.mxu0 }
 0x141   :  { %174 = vst.msk [vmem:[%s324_s2 + $0x18] sm:$0xff] %vm170_vm3, %v131_v28 }
 0x148   :  { %v134_v29 = vpop.f32.mrf.mxu1 }
 0x149   :  { %175 = vst.msk [vmem:[%s324_s2 + $0x20] sm:$0xff] %vm170_vm3, %v134_v29 }
 0x150   :  { %v137_v30 = vpop.f32.mrf.mxu1 }
 0x151   :  { %176 = vst.msk [vmem:[%s324_s2 + $0x28] sm:$0xff] %vm170_vm3, %v137_v30 }
 0x158   :  { %v140_v31 = vpop.f32.mrf.mxu1 }
 0x159   :  { %177 = vst.msk [vmem:[%s324_s2 + $0x30] sm:$0xff] %vm170_vm3, %v140_v31 }
 0x160   :  { %v143_v32 = vpop.f32.mrf.mxu1 }
 0x161   :  { %178 = vst.msk [vmem:[%s324_s2 + $0x38] sm:$0xff] %vm170_vm3, %v143_v32 }
 0x16e   :  { %v146_v33 = vpop.f32.mrf.mxu2 }
 0x16f   :  { %179 = vst.msk [vmem:[%s324_s2 + $0x40] sm:$0xff] %vm170_vm3, %v146_v33 }
 0x176   :  { %v149_v34 = vpop.f32.mrf.mxu2 }
 0x177   :  { %180 = vst.msk [vmem:[%s324_s2 + $0x48] sm:$0xff] %vm170_vm3, %v149_v34 }
 0x17e   :  { %v152_v35 = vpop.f32.mrf.mxu2 }
 0x17f   :  { %181 = vst.msk [vmem:[%s324_s2 + $0x50] sm:$0xff] %vm170_vm3, %v152_v35 }
 0x186   :  { %v155_v36 = vpop.f32.mrf.mxu2 }
 0x187   :  { %182 = vst.msk [vmem:[%s324_s2 + $0x58] sm:$0xff] %vm170_vm3, %v155_v36 }
 0x18e   :  { %v158_v37 = vpop.f32.mrf.mxu3 }
 0x18f   :  { %183 = vst.msk [vmem:[%s324_s2 + $0x60] sm:$0xff] %vm170_vm3, %v158_v37 }
 0x196   :  { %v161_v38 = vpop.f32.mrf.mxu3 }
 0x197   :  { %184 = vst.msk [vmem:[%s324_s2 + $0x68] sm:$0xff] %vm170_vm3, %v161_v38 }
 0x19e   :  { %v164_v39 = vpop.f32.mrf.mxu3 }
 0x19f   :  { %185 = vst.msk [vmem:[%s324_s2 + $0x70] sm:$0xff] %vm170_vm3, %v164_v39 }
 0x1a6   :  { %v167_v40 = vpop.f32.mrf.mxu3 }
 0x1a7   :  { %186 = vst.msk [vmem:[%s324_s2 + $0x78] sm:$0xff] %vm170_vm3, %v167_v40 }

</bundles_post_ra>
